<compile_context>
chip_gen: v6e
topology: v6e:2x2x1
jax: 0.10.0
libtpu: 0.0.40
codegen_flags: <defaults>
</compile_context>

<pallas_src>
import functools

import numpy as np
import jax
import jax.numpy as jnp
from jax.experimental import pallas as pl
from jax.experimental.pallas import tpu as pltpu

F_PAD = 128  # lane-dense width for the stacked filter/output dimension


def _round_up(x, m):
    return (x + m - 1) // m * m


# ----------------------------------------------------------------------------
# Fused kernel (one grid step = one tile of tb batches):
#   patches: [tb, L_pad, K] bf16   (im2col of the embedding, K = fs_max*H)
#   w      : [K, F_PAD]    bf16    (all conv branches stacked, zero padded)
#   b      : [1, F_PAD]    f32     (stacked conv biases)
#   mask   : [L_pad, F_PAD] f32    (1.0 where the time position is valid)
#   fcw    : [1, F_PAD]    f32     (fc weight, zero padded)
#   fcb    : [1, 1]        f32
#   out    : [tb, 1]       f32
# ----------------------------------------------------------------------------
def _fused_kernel(patch_ref, w_ref, b_ref, mask_ref, fcw_ref, fcb_ref, out_ref):
    tb, l_pad, k = patch_ref.shape
    # Explicit 2-D (tb*L_pad, K) @ (K, F_PAD) contraction: collapses the batch
    # and time axes into MXU rows (no per-batch M=L matmuls).
    p2d = patch_ref[...].reshape(tb * l_pad, k)
    conv = jnp.dot(p2d, w_ref[...], preferred_element_type=jnp.float32)
    act = jnp.maximum(conv + b_ref[...], 0.0)             # bias + ReLU (VPU)
    # Zero invalid / padded time positions.  Safe ONLY because act >= 0.
    act = act.reshape(tb, l_pad, -1) * mask_ref[...]
    pooled = jnp.max(act, axis=1)                          # time-max (XLU) [tb, F_PAD]
    # fc as VPU multiply + lane reduction (avoids an N=1 MXU matmul).
    out_ref[...] = (
        jnp.sum(pooled * fcw_ref[...], axis=1, keepdims=True) + fcb_ref[...]
    )


# ----------------------------------------------------------------------------
# One-time parameter packing: stack all conv branches into a single lane-dense
# weight/bias/mask and pad the fc weight to F_PAD lanes.
#   conv_weights[j]: [fs_j, H, n_filters]   (PyTorch [F,1,fs,H] pre-transposed)
#   conv_biases[j] : [1, n_filters]
#   fc_w           : [len(filter_sizes)*n_filters, 1]
#   fc_b           : [1, 1]
# ----------------------------------------------------------------------------
def pack_params(conv_weights, conv_biases, fc_w, fc_b, seq_len):
    filter_sizes = tuple(int(w.shape[0]) for w in conv_weights)
    H = int(conv_weights[0].shape[1])
    n_filters = int(conv_weights[0].shape[2])
    fs_max, fs_min = max(filter_sizes), min(filter_sizes)
    L = seq_len - fs_min + 1                      # positions covering all branches
    L_pad = _round_up(L, 8)                       # sublane-aligned time axis
    F_total = len(filter_sizes) * n_filters
    assert F_total <= F_PAD

    w_stack = np.zeros((fs_max, H, F_PAD), np.float32)
    b_stack = np.zeros((1, F_PAD), np.float32)
    valid = np.zeros((F_PAD,), np.int32)          # valid conv positions per column
    for j, (w, b, fs) in enumerate(zip(conv_weights, conv_biases, filter_sizes)):
        cols = slice(j * n_filters, (j + 1) * n_filters)
        w_stack[:fs, :, cols] = np.asarray(w)
        b_stack[:, cols] = np.asarray(b).reshape(1, n_filters)
        valid[cols] = seq_len - fs + 1
    mask = (np.arange(L_pad)[:, None] < valid[None, :]).astype(np.float32)

    fcw = np.zeros((1, F_PAD), np.float32)
    fcw[0, :F_total] = np.asarray(fc_w).reshape(-1)
    fcb = np.asarray(fc_b).reshape(1, 1).astype(np.float32)

    return dict(
        w=jnp.asarray(w_stack.reshape(fs_max * H, F_PAD), jnp.bfloat16),
        b=jnp.asarray(b_stack),
        mask=jnp.asarray(mask),
        fcw=jnp.asarray(fcw),
        fcb=jnp.asarray(fcb),
        fs_max=fs_max,
        fs_min=fs_min,
    )


# ----------------------------------------------------------------------------
# Forward pass (post-ALBERT).  Dropout is identity (eval / inference).
# ----------------------------------------------------------------------------
@functools.partial(jax.jit, static_argnames=("fs_max", "fs_min", "tb"))
def cnn_forward(embedded, w, b, mask, fcw, fcb, *, fs_max, fs_min, tb=8):
    B, S, H = embedded.shape
    K = fs_max * H
    L = S - fs_min + 1
    L_pad = _round_up(L, 8)
    B_pad = _round_up(B, tb)

    # im2col (wrapper-side layout plumbing).  Cast to bf16 BEFORE pad/stack so
    # the im2col intermediate is half the HBM footprint.  Padded / out-of-branch
    # rows hit zero weights and the post-ReLU mask inside the kernel.
    emb = embedded.astype(jnp.bfloat16)
    emb = jnp.pad(emb, ((0, B_pad - B), (0, L_pad + fs_max - 1 - S), (0, 0)))
    patches = jnp.stack(
        [jax.lax.slice_in_dim(emb, k, k + L_pad, axis=1) for k in range(fs_max)],
        axis=2,
    ).reshape(B_pad, L_pad, K)

    out = pl.pallas_call(
        _fused_kernel,
        out_shape=jax.ShapeDtypeStruct((B_pad, 1), jnp.float32),
        grid_spec=pltpu.PrefetchScalarGridSpec(
            num_scalar_prefetch=0,
            grid=(B_pad // tb,),
            in_specs=[
                pl.BlockSpec((tb, L_pad, K), lambda i: (i, 0, 0)),   # patch tile
                pl.BlockSpec((K, F_PAD), lambda i: (0, 0)),          # resident params
                pl.BlockSpec((1, F_PAD), lambda i: (0, 0)),
                pl.BlockSpec((L_pad, F_PAD), lambda i: (0, 0)),
                pl.BlockSpec((1, F_PAD), lambda i: (0, 0)),
                pl.BlockSpec((1, 1), lambda i: (0, 0)),
            ],
            out_specs=pl.BlockSpec((tb, 1), lambda i: (i, 0)),
        ),
        compiler_params=pltpu.CompilerParams(
            dimension_semantics=("parallel",),   # v7x: shard batch tiles across TCs
        ),
    )(patches, w, b, mask, fcw, fcb)
    return out[:B]


# ----------------------------------------------------------------------------
# Pure-JAX reference (f32) for a numerical sanity check.
# ----------------------------------------------------------------------------
def reference_forward(embedded, conv_weights, conv_biases, fc_w, fc_b):
    pooled = []
    for w, b in zip(conv_weights, conv_biases):
        fs = w.shape[0]
        L = embedded.shape[1] - fs + 1
        conv = sum(
            jnp.einsum("bsh,hf->bsf", embedded[:, k:k + L, :], w[k])
            for k in range(fs)
        ) + b
        pooled.append(jnp.max(jnp.maximum(conv, 0.0), axis=1))
    cat = jnp.concatenate(pooled, axis=1)
    return cat @ fc_w + fc_b


if __name__ == "__main__":
    # Small, deterministic configuration consistent with the module.
    B, S, H = 2, 16, 32          # batch, seq_len, ALBERT hidden_size
    n_filters = 8
    filter_sizes = (2, 3, 4)

    key = jax.random.PRNGKey(0)
    keys = jax.random.split(key, 2 + 2 * len(filter_sizes) + 2)

    # ALBERT output treated as an input (external pretrained encoder).
    embedded = jax.random.normal(keys[0], (B, S, H), dtype=jnp.float32)

    # Conv2d(in_channels=1, out_channels=n_filters, kernel_size=(fs, H));
    # PyTorch weight layout [F, 1, fs, H] stored here pre-transposed to [fs, H, F].
    conv_weights, conv_biases = [], []
    for i, fs in enumerate(filter_sizes):
        w = 0.1 * jax.random.normal(keys[1 + 2 * i], (fs, H, n_filters), jnp.float32)
        b = 0.1 * jax.random.normal(keys[2 + 2 * i], (1, n_filters), jnp.float32)
        conv_weights.append(w)
        conv_biases.append(b)

    # fc: Linear(len(filter_sizes) * n_filters, 1)
    D = len(filter_sizes) * n_filters
    fc_w = 0.1 * jax.random.normal(keys[-2], (D, 1), jnp.float32)
    fc_b = 0.1 * jax.random.normal(keys[-1], (1, 1), jnp.float32)

    packed = pack_params(conv_weights, conv_biases, fc_w, fc_b, seq_len=S)
    out = cnn_forward(
        embedded, packed["w"], packed["b"], packed["mask"],
        packed["fcw"], packed["fcb"],
        fs_max=packed["fs_max"], fs_min=packed["fs_min"],
    )
    out = jax.block_until_ready(out)
    assert out.shape == (B, 1), out.shape

    # Sanity check vs f32 reference (tolerance sized for bf16 operands,
    # f32 accumulation over K=128).
    ref = reference_forward(embedded, conv_weights, conv_biases, fc_w, fc_b)
    err = float(jnp.max(jnp.abs(out - ref)))
    assert err < 2e-2, f"max abs err {err}"
    print("KERNEL_OK")
</pallas_src>

<mosaic_0001>
module attributes {stable_mosaic.version = 11 : i64} {
  func.func @_fused_kernel(%arg0: i32, %arg1: memref<8x16x128xbf16, #tpu.memory_space<vmem>>, %arg2: memref<128x128xbf16, #tpu.memory_space<vmem>>, %arg3: memref<1x128xf32, #tpu.memory_space<vmem>>, %arg4: memref<16x128xf32, #tpu.memory_space<vmem>>, %arg5: memref<1x128xf32, #tpu.memory_space<vmem>>, %arg6: memref<1x1xf32, #tpu.memory_space<vmem>>, %arg7: memref<8x1xf32, #tpu.memory_space<vmem>>) attributes {dimension_semantics = [#tpu.dimension_semantics<parallel>], iteration_bounds = array<i64: 1>, scalar_prefetch = 0 : i64, scratch_operands = 0 : i64, tpu.core_type = #tpu.core_type<tc>, window_params = [{transform_indices = @transform_0, window_bounds = array<i64: 8, 16, 128>}, {pipeline_mode = #tpu.pipeline_mode<synchronous>, transform_indices = @transform_1, window_bounds = array<i64: 128, 128>}, {pipeline_mode = #tpu.pipeline_mode<synchronous>, transform_indices = @transform_2, window_bounds = array<i64: 1, 128>}, {pipeline_mode = #tpu.pipeline_mode<synchronous>, transform_indices = @transform_3, window_bounds = array<i64: 16, 128>}, {pipeline_mode = #tpu.pipeline_mode<synchronous>, transform_indices = @transform_4, window_bounds = array<i64: 1, 128>}, {pipeline_mode = #tpu.pipeline_mode<synchronous>, transform_indices = @transform_5, window_bounds = array<i64: 1, 1>}, {transform_indices = @transform_6, window_bounds = array<i64: 8, 1>}]} {
    %c0 = arith.constant 0 : index
    %c0_0 = arith.constant 0 : index
    %c0_1 = arith.constant 0 : index
    %0 = vector.load %arg1[%c0, %c0_0, %c0_1] : memref<8x16x128xbf16, #tpu.memory_space<vmem>>, vector<8x16x128xbf16>
    %1 = vector.shape_cast %0 : vector<8x16x128xbf16> to vector<128x128xbf16>
    %c0_2 = arith.constant 0 : index
    %c0_3 = arith.constant 0 : index
    %2 = vector.load %arg2[%c0_2, %c0_3] : memref<128x128xbf16, #tpu.memory_space<vmem>>, vector<128x128xbf16>
    %cst = arith.constant dense<0.000000e+00> : vector<128x128xf32>
    %3 = tpu.matmul %1, %2, %cst {dimension_numbers = #tpu.dot_dimension_numbers<[1], [0], [0], [1], [0, 0, 1, 1], [], []>} : vector<128x128xbf16>, vector<128x128xbf16>, vector<128x128xf32> -> vector<128x128xf32>
    %c0_4 = arith.constant 0 : index
    %c0_5 = arith.constant 0 : index
    %4 = vector.load %arg3[%c0_4, %c0_5] : memref<1x128xf32, #tpu.memory_space<vmem>>, vector<1x128xf32>
    %5 = vector.broadcast %4 : vector<1x128xf32> to vector<128x128xf32>
    %6 = arith.addf %3, %5 : vector<128x128xf32>
    %cst_6 = arith.constant 0.000000e+00 : f32
    %7 = vector.broadcast %cst_6 : f32 to vector<128x128xf32>
    %8 = arith.maximumf %6, %7 : vector<128x128xf32>
    %9 = vector.shape_cast %8 : vector<128x128xf32> to vector<8x16x128xf32>
    %c0_7 = arith.constant 0 : index
    %c0_8 = arith.constant 0 : index
    %10 = vector.load %arg4[%c0_7, %c0_8] : memref<16x128xf32, #tpu.memory_space<vmem>>, vector<16x128xf32>
    %11 = vector.shape_cast %10 : vector<16x128xf32> to vector<1x16x128xf32>
    %12 = vector.broadcast %11 : vector<1x16x128xf32> to vector<8x16x128xf32>
    %13 = arith.mulf %9, %12 : vector<8x16x128xf32>
    %cst_9 = arith.constant dense<0xFF800000> : vector<8x128xf32>
    %14 = vector.multi_reduction <maximumf>, %13, %cst_9 [1] : vector<8x16x128xf32> to vector<8x128xf32>
    %c0_10 = arith.constant 0 : index
    %c0_11 = arith.constant 0 : index
    %15 = vector.load %arg5[%c0_10, %c0_11] : memref<1x128xf32, #tpu.memory_space<vmem>>, vector<1x128xf32>
    %16 = vector.broadcast %15 : vector<1x128xf32> to vector<8x128xf32>
    %17 = arith.mulf %14, %16 : vector<8x128xf32>
    %cst_12 = arith.constant dense<0.000000e+00> : vector<8xf32>
    %18 = vector.multi_reduction <add>, %17, %cst_12 [1] : vector<8x128xf32> to vector<8xf32>
    %19 = vector.shape_cast %18 : vector<8xf32> to vector<8x1xf32>
    %c0_13 = arith.constant 0 : index
    %c0_14 = arith.constant 0 : index
    %20 = vector.load %arg6[%c0_13, %c0_14] : memref<1x1xf32, #tpu.memory_space<vmem>>, vector<1x1xf32>
    %21 = vector.broadcast %20 : vector<1x1xf32> to vector<8x1xf32>
    %22 = arith.addf %19, %21 : vector<8x1xf32>
    %c0_15 = arith.constant 0 : index
    %c0_16 = arith.constant 0 : index
    %23 = vector.load %arg7[%c0_15, %c0_16] : memref<8x1xf32, #tpu.memory_space<vmem>>, vector<8x1xf32>
    tpu.vector_store %arg7[%c0_15, %c0_16], %22 {strides = array<i32>} : memref<8x1xf32, #tpu.memory_space<vmem>>, vector<8x1xf32>,
    return
  }
  func.func @transform_0(%arg0: i32) -> (i32, i32, i32) {
    %c0_i32 = arith.constant 0 : i32
    %c0_i32_0 = arith.constant 0 : i32
    %c0_i32_1 = arith.constant 0 : i32
    return %arg0, %c0_i32, %c0_i32_0 : i32, i32, i32
  }
  func.func @transform_1(%arg0: i32) -> (i32, i32) {
    %c0_i32 = arith.constant 0 : i32
    %c0_i32_0 = arith.constant 0 : i32
    %c0_i32_1 = arith.constant 0 : i32
    return %c0_i32, %c0_i32_0 : i32, i32
  }
  func.func @transform_2(%arg0: i32) -> (i32, i32) {
    %c0_i32 = arith.constant 0 : i32
    %c0_i32_0 = arith.constant 0 : i32
    %c0_i32_1 = arith.constant 0 : i32
    return %c0_i32, %c0_i32_0 : i32, i32
  }
  func.func @transform_3(%arg0: i32) -> (i32, i32) {
    %c0_i32 = arith.constant 0 : i32
    %c0_i32_0 = arith.constant 0 : i32
    %c0_i32_1 = arith.constant 0 : i32
    return %c0_i32, %c0_i32_0 : i32, i32
  }
  func.func @transform_4(%arg0: i32) -> (i32, i32) {
    %c0_i32 = arith.constant 0 : i32
    %c0_i32_0 = arith.constant 0 : i32
    %c0_i32_1 = arith.constant 0 : i32
    return %c0_i32, %c0_i32_0 : i32, i32
  }
  func.func @transform_5(%arg0: i32) -> (i32, i32) {
    %c0_i32 = arith.constant 0 : i32
    %c0_i32_0 = arith.constant 0 : i32
    %c0_i32_1 = arith.constant 0 : i32
    return %c0_i32, %c0_i32_0 : i32, i32
  }
  func.func @transform_6(%arg0: i32) -> (i32, i32) {
    %c0_i32 = arith.constant 0 : i32
    %c0_i32_0 = arith.constant 0 : i32
    return %arg0, %c0_i32 : i32, i32
  }
}

</mosaic_0001>

<bundles_post_ra>
// kernel: cnn_forward.1
= control target key start
LH: loop header
LB: loop body
LE: loop exit
PB: predicated region body
PF: predicated region fallthrough
CT: control target
= control target key end

     0   :  { %vm372_vm0 = vcmask 1041409   ;;  %vm375_vm1 = vcmask 1042434   ;;  %vm378_vm2 = vcmask 1043459   ;;  %vm381_vm3 = vcmask 1044484   ;;  %s647_s1 = inlined_call_operand.vmem [shape: bf16[128,128], index: 1, kind: input, shape index: {}]   ;;  %s648_s0 = inlined_call_operand.vmem [shape: bf16[8,16,128], index: 0, kind: input, shape index: {}]   ;;  %s649_s5 = inlined_call_operand.<no memory space> [shape: f32[1,1], index: 5, kind: input, shape index: {}]   ;;  %s650_s2 = inlined_call_operand.vmem [shape: f32[1,128], index: 2, kind: input, shape index: {}]   ;;  %s651_s3 = inlined_call_operand.vmem [shape: f32[16,128], index: 3, kind: input, shape index: {}]   ;;  %s652_s4 = inlined_call_operand.vmem [shape: f32[1,128], index: 4, kind: input, shape index: {}]   ;;  %s653_s6 = inlined_call_operand.vmem [shape: f32[8,1], index: 6, kind: output, shape index: {}]  }
   0x1   :  { %v492_v0 = vld [vmem:[%s647_s1 + $0x38] sm:$0xff]   ;;  %v493_v1 = vld [vmem:[%s647_s1 + $0x30] sm:$0xff]   ;;  %v494_v2 = vld [vmem:[%s647_s1 + $0x28] sm:$0xff]   ;;  %v11_v16 = vstv %s649_s5  ;;  %vm384_vm4 = vcmask 1045509   ;;  %vm387_vm5 = vcmask 1046534   ;;  %vm390_vm6 = vcmask 1047559  }
   0x2   :  { %444 = vmatprep.subr.bf16.mxu0 %v492_v0  ;;  %476 = vmatprep.subr.bf16.mxu1 %v492_v0  ;;  %v495_v3 = vld [vmem:[%s647_s1 + $0x20] sm:$0xff]   ;;  %v496_v6 = vld [vmem:[%s647_s1 + $0x18] sm:$0xff]   ;;  %v497_v7 = vld [vmem:[%s647_s1 + $0x10] sm:$0xff]   ;;  %12 = vst [vmem:[#allocation2] sm:$0x1] %v11_v16  ;;  %vm403_vm7 = vcmask 7168  }
   0x3   :  { %445 = vmatpush3.bf16.msra.mxu0 %v492_v0  ;;  %484 = vmatpush3.bf16.msra.mxu1 %v492_v0  ;;  %v500_v4 = vld [vmem:[%s648_s0] sm:$0xff]   ;;  %v498_v8 = vld [vmem:[%s647_s1 + $0x8] sm:$0xff]   ;;  %v504_v12 = vld [vmem:[%s648_s0 + $0x10] sm:$0xff]  }
   0x4   :  { %446 = vmatprep.subr.bf16.mxu0 %v493_v1  ;;  %477 = vmatprep.subr.bf16.mxu1 %v493_v1  ;;  %v501_v5 = vld [vmem:[%s648_s0 + $0x20] sm:$0xff]   ;;  %v502_v10 = vld [vmem:[%s648_s0 + $0x8] sm:$0xff]   ;;  %v505_v13 = vld [vmem:[%s648_s0 + $0x30] sm:$0xff]  }
   0x5   :  { %460 = vmatprep.mubr.bf16.mxu0 %v500_v4  ;;  %468 = vmatprep.mubr.bf16.mxu1 %v501_v5  ;;  %v499_v9 = vld [vmem:[%s647_s1] sm:$0xff]   ;;  %v503_v11 = vld [vmem:[%s648_s0 + $0x28] sm:$0xff]   ;;  %v506_v14 = vld [vmem:[%s648_s0 + $0x18] sm:$0xff]  }
   0x6   :  { %v507_v15 = vld [vmem:[%s648_s0 + $0x38] sm:$0xff]   ;;  %v597_v17 = vld [vmem:[%s650_s2] ss:$0 sm:$0xff]  ;;  %v613_v37 = vld [vmem:[%s651_s3 + $0x8] sm:$0xff] }
   0x7   :  { %447 = vmatpush3.bf16.msra.mxu0 %v493_v1  ;;  %485 = vmatpush3.bf16.msra.mxu1 %v493_v1  ;;  %v608_v34 = vld [vmem:[%s651_s3] sm:$0xff] }
   0x8   :  { %448 = vmatprep.subr.bf16.mxu0 %v494_v2  ;;  %478 = vmatprep.subr.bf16.mxu1 %v494_v2 }
   0xb   :  { %449 = vmatpush3.bf16.msra.mxu0 %v494_v2  ;;  %486 = vmatpush3.bf16.msra.mxu1 %v494_v2 }
   0xc   :  { %450 = vmatprep.subr.bf16.mxu0 %v495_v3  ;;  %479 = vmatprep.subr.bf16.mxu1 %v495_v3 }
   0xf   :  { %451 = vmatpush3.bf16.msra.mxu0 %v495_v3  ;;  %487 = vmatpush3.bf16.msra.mxu1 %v495_v3 }
  0x10   :  { %452 = vmatprep.subr.bf16.mxu0 %v496_v6  ;;  %480 = vmatprep.subr.bf16.mxu1 %v496_v6 }
  0x13   :  { %453 = vmatpush3.bf16.msra.mxu0 %v496_v6  ;;  %488 = vmatpush3.bf16.msra.mxu1 %v496_v6 }
  0x14   :  { %454 = vmatprep.subr.bf16.mxu0 %v497_v7  ;;  %481 = vmatprep.subr.bf16.mxu1 %v497_v7 }
  0x17   :  { %455 = vmatpush3.bf16.msra.mxu0 %v497_v7  ;;  %489 = vmatpush3.bf16.msra.mxu1 %v497_v7 }
  0x18   :  { %456 = vmatprep.subr.bf16.mxu0 %v498_v8  ;;  %482 = vmatprep.subr.bf16.mxu1 %v498_v8 }
  0x1b   :  { %457 = vmatpush3.bf16.msra.mxu0 %v498_v8  ;;  %490 = vmatpush3.bf16.msra.mxu1 %v498_v8 }
  0x1c   :  { %458 = vmatprep.subr.bf16.mxu0 %v499_v9  ;;  %483 = vmatprep.subr.bf16.mxu1 %v499_v9 }
  0x1f   :  { %459 = vmatpush3.bf16.msra.mxu0 %v499_v9  ;;  %491 = vmatpush3.bf16.msra.mxu1 %v499_v9 }
  0x22   :  { %461 = vmatmul.mubr.bf16.vlgmr.msra.gmra.mxu0 %v502_v10  ;;  %469 = vmatmul.mubr.bf16.vlgmr.msra.gmra.mxu1 %v503_v11 }
  0x23   :  { %464 = vmatprep.mubr.bf16.mxu0 %v504_v12  ;;  %472 = vmatprep.mubr.bf16.mxu1 %v505_v13 }
  0x2a   :  { %465 = vmatmul.mubr.bf16.gmra.mxu0 %v506_v14  ;;  %473 = vmatmul.mubr.bf16.gmra.mxu1 %v507_v15 }
  0xe2   :  { %v462_v18 = vpop.f32.mrf.mxu0  ;;  %v470_v19 = vpop.f32.mrf.mxu1 }
  0xe3   :  { %v236_v20 = vadd.f32 %v470_v19, %v597_v17  ;;  %v204_v21 = vadd.f32 %v462_v18, %v597_v17 }
  0xe4   :  { %v195_v22 = vpop.f32.mrf.mxu0  ;;  %v227_v23 = vpop.f32.mrf.mxu1 }
  0xe5   :  { %v196_v24 = vadd.f32 %v597_v17, %v195_v22  ;;  %v228_v25 = vadd.f32 %v597_v17, %v227_v23  ;;  %v268_v26 = vmax.f32 %v236_v20, 0.0  ;;  %v260_v29 = vmax.f32 %v204_v21, 0.0 }
  0xe6   :  { %v463_v27 = vpop.f32.mrf.mxu0  ;;  %v471_v28 = vpop.f32.mrf.mxu1 }
  0xe7   :  { %v207_v30 = vadd.f32 %v463_v27, %v597_v17  ;;  %v239_v31 = vadd.f32 %v471_v28, %v597_v17  ;;  %v258_v35 = vmax.f32 %v196_v24, 0.0  ;;  %v266_v36 = vmax.f32 %v228_v25, 0.0 }
  0xe8   :  { %v198_v32 = vpop.f32.mrf.mxu0  ;;  %v230_v33 = vpop.f32.mrf.mxu1  ;;  %v286_v40 = vmul.f32 %v608_v34, %v268_v26  ;;  %v278_v48 = vmul.f32 %v608_v34, %v260_v29 }
  0xe9   :  { %v199_v38 = vadd.f32 %v597_v17, %v198_v32  ;;  %v231_v39 = vadd.f32 %v597_v17, %v230_v33  ;;  %v261_v41 = vmax.f32 %v207_v30, 0.0  ;;  %v269_v42 = vmax.f32 %v239_v31, 0.0 }
  0xea   :  { %v466_v43 = vpop.f32.mrf.mxu0  ;;  %v474_v44 = vpop.f32.mrf.mxu1  ;;  %v276_v54 = vmul.f32 %v608_v34, %v258_v35  ;;  %v284_v55 = vmul.f32 %v608_v34, %v266_v36 }
  0xeb   :  { %v259_v45 = vmax.f32 %v199_v38, 0.0  ;;  %v267_v46 = vmax.f32 %v231_v39, 0.0  ;;  %v252_v47 = vadd.f32 %v474_v44, %v597_v17  ;;  %v279_v49 = vmul.f32 %v613_v37, %v261_v41 }
  0xec   :  { %v287_v50 = vmul.f32 %v613_v37, %v269_v42  ;;  %v220_v51 = vadd.f32 %v466_v43, %v597_v17  ;;  %v211_v52 = vpop.f32.mrf.mxu0  ;;  %v243_v53 = vpop.f32.mrf.mxu1 }
  0xed   :  { %v277_v56 = vmul.f32 %v613_v37, %v259_v45  ;;  %v285_v57 = vmul.f32 %v613_v37, %v267_v46  ;;  %v299_v58 = vmax.f32 %v278_v48, %v279_v49  ;;  %v272_v60 = vmax.f32 %v252_v47, 0.0 }
  0xee   :  { %v327_v59 = vmax.f32 %v286_v40, %v287_v50  ;;  %v212_v61 = vadd.f32 %v597_v17, %v211_v52  ;;  %v467_v62 = vpop.f32.mrf.mxu0  ;;  %v475_v63 = vpop.f32.mrf.mxu1  ;;  %v244_v2 = vadd.f32 %v597_v17, %v243_v53  ;;  %v264_v5 = vmax.f32 %v220_v51, 0.0 }
  0xef   :  { %v292_v0 = vmax.f32 %v276_v54, %v277_v56  ;;  %v320_v1 = vmax.f32 %v284_v55, %v285_v57  ;;  %v300_v3 = vrot.slane %v299_v58, 4  ;;  %v223_v8 = vadd.f32 %v467_v62, %v597_v17 }
  0xf0   :  { %v328_v4 = vrot.slane %v327_v59, 4  ;;  %v255_v9 = vadd.f32 %v475_v63, %v597_v17  ;;  %v214_v10 = vpop.f32.mrf.mxu0  ;;  %v246_v11 = vpop.f32.mrf.mxu1  ;;  %v290_v13 = vmul.f32 %v608_v34, %v272_v60  ;;  %v262_v14 = vmax.f32 %v212_v61, 0.0 }
  0xf1   :  { %v293_v6 = vrot.slane %v292_v0, 4  ;;  %v321_v7 = vrot.slane %v320_v1, 4  ;;  %v301_v12 = vmax.f32 %v299_v58, %v300_v3  ;;  %v270_v16 = vmax.f32 %v244_v2, 0.0 }
  0xf2   :  { %v265_v18 = vmax.f32 %v223_v8, 0.0  ;;  %v273_v19 = vmax.f32 %v255_v9, 0.0  ;;  %v215_v22 = vadd.f32 %v597_v17, %v214_v10  ;;  %v247_v23 = vadd.f32 %v597_v17, %v246_v11 }
  0xf3   :  { %v294_v15 = vmax.f32 %v292_v0, %v293_v6  ;;  %v302_v20 = vrot.slane %v301_v12, 2  ;;  %v322_v21 = vmax.f32 %v320_v1, %v321_v7  ;;  %v329_v24 = vmax.f32 %v327_v59, %v328_v4  ;;  %v426_v59 = vld [vmem:[%s652_s4] ss:$0 sm:$0xff] }
  0xf4   :  { %v282_v25 = vmul.f32 %v608_v34, %v264_v5  ;;  %v283_v26 = vmul.f32 %v613_v37, %v265_v18  ;;  %v291_v27 = vmul.f32 %v613_v37, %v273_v19  ;;  %v280_v28 = vmul.f32 %v608_v34, %v262_v14 }
  0xf5   :  { %v263_v29 = vmax.f32 %v215_v22, 0.0  ;;  %v271_v30 = vmax.f32 %v247_v23, 0.0  ;;  %v303_v31 = vmax.f32 %v301_v12, %v302_v20  ;;  %v295_v32 = vrot.slane %v294_v15, 2 }
  0xf6   :  { %v313_v33 = vmax.f32 %v282_v25, %v283_v26  ;;  %v341_v35 = vmax.f32 %v290_v13, %v291_v27  ;;  %v323_v36 = vrot.slane %v322_v21, 2  ;;  %v288_v38 = vmul.f32 %v608_v34, %v270_v16 }
  0xf7   :  { %v281_v17 = vmul.f32 %v613_v37, %v263_v29  ;;  %v289_v39 = vmul.f32 %v613_v37, %v271_v30  ;;  %v330_v40 = vrot.slane %v329_v24, 2  ;;  %v304_v45 = vrot.slane %v303_v31, 1 }
  0xf8   :  { %v314_v41 = vrot.slane %v313_v33, 4  ;;  %v342_v42 = vrot.slane %v341_v35, 4  ;;  %v296_v46 = vmax.f32 %v294_v15, %v295_v32  ;;  %v324_v49 = vmax.f32 %v322_v21, %v323_v36 }
  0xf9   :  { %v306_v43 = vmax.f32 %v280_v28, %v281_v17  ;;  %v334_v44 = vmax.f32 %v288_v38, %v289_v39  ;;  %v331_v52 = vmax.f32 %v329_v24, %v330_v40  ;;  %v305_v56 = vmax.f32 %v303_v31, %v304_v45  ;;  %v427_v38 = vld [vmem:[#allocation2] ss:$0 sm:$0xff] }
  0xfa   :  { %v315_v47 = vmax.f32 %v313_v33, %v314_v41  ;;  %v343_v48 = vmax.f32 %v341_v35, %v342_v42  ;;  %v297_v57 = vrot.slane %v296_v46, 1  ;;  %v325_v60 = vrot.slane %v324_v49, 1 }
  0xfb   :  { %v307_v50 = vrot.slane %v306_v43, 4  ;;  %v335_v51 = vrot.slane %v334_v44, 4  ;;  %v332_v63 = vrot.slane %v331_v52, 1  ;;  %v356_v3 = vmul.f32 %v426_v59, %v305_v56 }
  0xfc   :  { %v316_v53 = vrot.slane %v315_v47, 2  ;;  %v344_v54 = vrot.slane %v343_v48, 2  ;;  %v298_v4 = vmax.f32 %v296_v46, %v297_v57  ;;  %v326_v7 = vmax.f32 %v324_v49, %v325_v60 }
  0xfd   :  { %v308_v34 = vmax.f32 %v306_v43, %v307_v50  ;;  %v336_v55 = vmax.f32 %v334_v44, %v335_v51  ;;  %v333_v10 = vmax.f32 %v331_v52, %v332_v63  ;;  %v371_v13 = vrot.slane %v356_v3, 7 }
  0xfe   :  { %v317_v37 = vmax.f32 %v315_v47, %v316_v53  ;;  %v345_v58 = vmax.f32 %v343_v48, %v344_v54  ;;  %v355_v14 = vmul.f32 %v426_v59, %v298_v4  ;;  %v359_v19 = vmul.f32 %v426_v59, %v326_v7 }
  0xff   :  { %v309_v61 = vrot.slane %v308_v34, 2  ;;  %v337_v62 = vrot.slane %v336_v55, 2  ;;  %v360_v20 = vmul.f32 %v426_v59, %v333_v10 }
 0x100   :  { %v318_v0 = vrot.slane %v317_v37, 1  ;;  %v346_v6 = vrot.slane %v345_v58, 1  ;;  %v373_v24 = vsel %vm372_vm0, %v371_v13, %v355_v14  ;;  %v380_v27 = vrot.slane %v359_v19, 4 }
 0x101   :  { %v310_v1 = vmax.f32 %v308_v34, %v309_v61  ;;  %v338_v2 = vmax.f32 %v336_v55, %v337_v62  ;;  %v383_v29 = vrot.slane %v360_v20, 3 }
 0x102   :  { %v319_v5 = vmax.f32 %v317_v37, %v318_v0  ;;  %v347_v16 = vmax.f32 %v345_v58, %v346_v6 }
 0x103   :  { %v311_v8 = vrot.slane %v310_v1, 1  ;;  %v339_v9 = vrot.slane %v338_v2, 1 }
 0x104   :  { %v358_v15 = vmul.f32 %v426_v59, %v319_v5  ;;  %v362_v23 = vmul.f32 %v426_v59, %v347_v16 }
 0x105   :  { %v312_v11 = vmax.f32 %v310_v1, %v311_v8  ;;  %v340_v12 = vmax.f32 %v338_v2, %v339_v9 }
 0x106   :  { %v377_v25 = vrot.slane %v358_v15, 5  ;;  %v389_v33 = vrot.slane %v362_v23, 1 }
 0x107   :  { %v357_v18 = vmul.f32 %v426_v59, %v312_v11  ;;  %v361_v22 = vmul.f32 %v426_v59, %v340_v12 }
 0x109   :  { %v374_v21 = vrot.slane %v357_v18, 6  ;;  %v386_v31 = vrot.slane %v361_v22, 2 }
 0x10b   :  { %v376_v26 = vsel %vm375_vm1, %v374_v21, %v373_v24 }
 0x10c   :  { %v379_v28 = vsel %vm378_vm2, %v377_v25, %v376_v26 }
 0x10d   :  { %v382_v30 = vsel %vm381_vm3, %v380_v27, %v379_v28 }
 0x10e   :  { %v385_v32 = vsel %vm384_vm4, %v383_v29, %v382_v30 }
 0x10f   :  { %v388_v35 = vsel %vm387_vm5, %v386_v31, %v385_v32 }
 0x110   :  { %v391_v36 = vsel %vm390_vm6, %v389_v33, %v388_v35 }
 0x111   :  { %393 = vadd.xlane.f32.xlu0 %v391_v36 }
 0x19a   :  { %v394_v17 = vpop.xlane.xlu0 %393 }
 0x19b   :  { %v402_v39 = vadd.f32 %v427_v38, %v394_v17 }
 0x19d   :  { %404 = vst.msk [vmem:[%s653_s6] sm:$0xff] %vm403_vm7, %v402_v39 }

</bundles_post_ra>
